<compile_context>
chip_gen: v5e
topology: v5e:2x2
jax: 0.10.0
libtpu: 0.0.40
codegen_flags: <defaults>
</compile_context>

<pallas_src>
from functools import partial

import jax
import jax.numpy as jnp
from jax.experimental import pallas as pl
from jax.experimental.pallas import tpu as pltpu

INPUT_FEATS = 59   # hard-coded in the PyTorch module: Linear(59 + hidden, ...)
I2O_OUT = 90
O2O_OUT = 10
DROP_P = 0.5


# --------------------------------------------------------------------------
# Host-side parameter handling
# --------------------------------------------------------------------------
def init_params(key, hidden_size):
    """PyTorch-Linear-style init; weights stored transposed, i.e. (in, out)."""
    def linear(k, fan_in, fan_out):
        k1, k2 = jax.random.split(k)
        bound = float(1.0 / (fan_in ** 0.5))
        w = jax.random.uniform(k1, (fan_in, fan_out), jnp.float32, -bound, bound)
        b = jax.random.uniform(k2, (1, fan_out), jnp.float32, -bound, bound)
        return w, b

    H = hidden_size
    ks = jax.random.split(key, 5)
    w_i2o, b_i2o = linear(ks[0], INPUT_FEATS + H, I2O_OUT)
    w_i2h, b_i2h = linear(ks[1], INPUT_FEATS + H, H)
    w_i2h2, b_i2h2 = linear(ks[2], H, H)
    w_i2h3, b_i2h3 = linear(ks[3], H, H)
    w_o2o, b_o2o = linear(ks[4], I2O_OUT + H, O2O_OUT)
    return dict(w_i2o=w_i2o, b_i2o=b_i2o, w_i2h=w_i2h, b_i2h=b_i2h,
                w_i2h2=w_i2h2, b_i2h2=b_i2h2, w_i2h3=w_i2h3, b_i2h3=b_i2h3,
                w_o2o=w_o2o, b_o2o=b_o2o)


def fuse_params(p):
    """One-time host-side weight fusion (exact up to f32 rounding).

    * i2h -> i2h2 -> i2h3 (pure linear chain) collapsed into one matmul.
    * torch.cat(input, hidden) folded into split x-/h- weights.
    * o2o split into the i2o-output rows (w_top) and the new-hidden rows (w_bot).
    """
    w_hid = p["w_i2h"] @ p["w_i2h2"] @ p["w_i2h3"]
    b_h = (p["b_i2h"] @ p["w_i2h2"] @ p["w_i2h3"]
           + p["b_i2h2"] @ p["w_i2h3"] + p["b_i2h3"])
    return dict(
        w_xh=w_hid[:INPUT_FEATS],          # (59, H)  x -> hidden pre-activation
        w_hh=w_hid[INPUT_FEATS:],          # (H, H)   h -> hidden pre-activation
        b_h=b_h,                           # (1, H)
        w_xo=p["w_i2o"][:INPUT_FEATS],     # (59, 90) x -> i2o output
        w_ho=p["w_i2o"][INPUT_FEATS:],     # (H, 90)  old h -> i2o output
        b_o=p["b_i2o"],                    # (1, 90)
        w_top=p["w_o2o"][:I2O_OUT],        # (90, 10) i2o output -> logits
        w_bot=p["w_o2o"][I2O_OUT:],        # (H, 10)  new hidden -> logits
        b_o2o=p["b_o2o"],                  # (1, 10)
    )


def dropout_mask(key, shape, training=True):
    """Scaled Bernoulli mask matching torch.nn.Dropout(p=0.5) training mode."""
    if not training:
        return jnp.ones(shape, jnp.float32)
    keep = jax.random.bernoulli(key, 1.0 - DROP_P, shape)
    return keep.astype(jnp.float32) / (1.0 - DROP_P)


def ref_forward(p, x, h, mask):
    """Pure-JAX reference that mirrors myRNN.forward literally (unfused)."""
    combined = jnp.concatenate([x, h], axis=1)
    output = combined @ p["w_i2o"] + p["b_i2o"]
    hidden = combined @ p["w_i2h"] + p["b_i2h"]
    hidden = hidden @ p["w_i2h2"] + p["b_i2h2"]
    hidden = hidden @ p["w_i2h3"] + p["b_i2h3"]
    hidden = jnp.tanh(hidden)
    out_combined = jnp.concatenate([output, hidden], axis=1)
    output = out_combined @ p["w_o2o"] + p["b_o2o"]
    output = jax.nn.softmax(output, axis=1)
    return output * mask, hidden


# --------------------------------------------------------------------------
# Single-step kernel (== myRNN.forward).  Validation / serving API only.
# --------------------------------------------------------------------------
def rnn_step_kernel(x_ref, h_ref, mask_ref,
                    w_xh_ref, b_h_ref, w_hh_ref,
                    w_xo_ref, b_o_ref, w_ho_ref,
                    w_top_ref, w_bot_ref, b_o2o_ref,
                    out_ref, h_out_ref):
    x = x_ref[...]
    h = h_ref[...]
    hid = jnp.tanh(jnp.dot(x, w_xh_ref[...], preferred_element_type=jnp.float32)
                   + jnp.dot(h, w_hh_ref[...], preferred_element_type=jnp.float32)
                   + b_h_ref[...])
    i2o = (jnp.dot(x, w_xo_ref[...], preferred_element_type=jnp.float32)
           + jnp.dot(h, w_ho_ref[...], preferred_element_type=jnp.float32)
           + b_o_ref[...])
    logits = (jnp.dot(i2o, w_top_ref[...], preferred_element_type=jnp.float32)
              + jnp.dot(hid, w_bot_ref[...], preferred_element_type=jnp.float32)
              + b_o2o_ref[...])
    m = jnp.max(logits, axis=1, keepdims=True)
    e = jnp.exp(logits - m)
    probs = e / jnp.sum(e, axis=1, keepdims=True)
    out_ref[...] = (probs * mask_ref[...]).astype(out_ref.dtype)
    h_out_ref[...] = hid.astype(h_out_ref.dtype)


@jax.jit
def my_rnn_step(fused, x, h, drop_mask):
    """One myRNN.forward step: returns (output (B,10), hidden (B,H))."""
    B = x.shape[0]
    H = h.shape[1]
    vmem = pl.BlockSpec(memory_space=pltpu.MemorySpace.VMEM)
    return pl.pallas_call(
        rnn_step_kernel,
        out_shape=(jax.ShapeDtypeStruct((B, O2O_OUT), jnp.float32),
                   jax.ShapeDtypeStruct((B, H), jnp.float32)),
        in_specs=[vmem] * 12,
        out_specs=(vmem, vmem),
    )(x, h, drop_mask,
      fused["w_xh"], fused["b_h"], fused["w_hh"],
      fused["w_xo"], fused["b_o"], fused["w_ho"],
      fused["w_top"], fused["w_bot"], fused["b_o2o"])


# --------------------------------------------------------------------------
# Sequence kernel: whole recurrence, chunked over T, output path deferred.
# --------------------------------------------------------------------------
def _make_seq_kernel(t_chunk, batch, hidden):
    TC, B, H = t_chunk, batch, hidden

    def kernel(x_ref, h0_ref, mask_ref,
               w_xh_ref, b_h_ref, w_hh_ref,
               w_xo_ref, b_o_ref, w_ho_ref,
               w_top_ref, w_bot_ref, b_o2o_ref,
               out_ref, h_last_ref,
               zxh_scratch, h_scratch):
        c = pl.program_id(0)

        # Chunk-start hidden: h0 on the first chunk, carried scratch otherwise.
        @pl.when(c == 0)
        def _():
            h_scratch[pl.ds(0, B), :] = h0_ref[...]

        @pl.when(c != 0)
        def _():
            h_scratch[pl.ds(0, B), :] = h_scratch[pl.ds(TC * B, B), :]

        # (1) x-path for the whole chunk: ONE batched (TC*B, 59)x(59, H) matmul
        #     (bias folded in).  Off the serial critical path.
        zxh_scratch[...] = (
            jnp.dot(x_ref[...], w_xh_ref[...], preferred_element_type=jnp.float32)
            + b_h_ref[...])

        # (2) Serial recurrence: only h @ W_hh + tanh per step (1 MXU op/step).
        #     Statically unrolled (TC is a Python int); hidden stays in vregs,
        #     each step also lands in the VMEM slab for the deferred path.
        w_hh = w_hh_ref[...]
        h = h_scratch[pl.ds(0, B), :]
        for t in range(TC):
            pre = (zxh_scratch[pl.ds(t * B, B), :]
                   + jnp.dot(h, w_hh, preferred_element_type=jnp.float32))
            h = jnp.tanh(pre)
            h_scratch[pl.ds((t + 1) * B, B), :] = h

        # (3) Deferred output path, batched over the whole chunk (TC*B rows):
        #     i2o uses the OLD hidden, o2o uses the NEW hidden (matches the
        #     module's cat(input, hidden) / cat(output, new_hidden)).
        h_old = h_scratch[pl.ds(0, TC * B), :]
        h_new = h_scratch[pl.ds(B, TC * B), :]
        i2o = (jnp.dot(x_ref[...], w_xo_ref[...], preferred_element_type=jnp.float32)
               + jnp.dot(h_old, w_ho_ref[...], preferred_element_type=jnp.float32)
               + b_o_ref[...])
        logits = (jnp.dot(i2o, w_top_ref[...], preferred_element_type=jnp.float32)
                  + jnp.dot(h_new, w_bot_ref[...], preferred_element_type=jnp.float32)
                  + b_o2o_ref[...])
        # softmax(dim=1) -- exact divide (off the serial path; sums to 1).
        m = jnp.max(logits, axis=1, keepdims=True)
        e = jnp.exp(logits - m)
        probs = e / jnp.sum(e, axis=1, keepdims=True)
        # Dropout (mask pre-scaled by 1/(1-p)); single slab store per chunk.
        out_ref[...] = (probs * mask_ref[...]).astype(out_ref.dtype)

        # Final hidden: write only on the last chunk.
        @pl.when(c == pl.num_programs(0) - 1)
        def _():
            h_last_ref[...] = h_scratch[pl.ds(TC * B, B), :].astype(h_last_ref.dtype)

    return kernel


@partial(jax.jit, static_argnames=("t_chunk",))
def my_rnn_sequence(fused, x_seq, h0, drop_masks, *, t_chunk=None):
    """Whole recurrence in ONE pallas_call, grid over time-chunks.

    x_seq: (T, B, 59), h0: (B, H), drop_masks: (T, B, 10)
    Returns (outputs (T, B, 10), final hidden (B, H)).
    """
    T, B, F = x_seq.shape
    H = h0.shape[1]
    assert F == INPUT_FEATS
    if t_chunk is None:
        t_chunk = T
    assert T % t_chunk == 0
    TC = t_chunk
    C = T // TC

    # Host-side flattening (layout plumbing only): lets the kernel read/write
    # contiguous (TC*B, lanes) slabs with no in-kernel reshapes.
    x_flat = x_seq.reshape(T * B, F)
    m_flat = drop_masks.reshape(T * B, O2O_OUT)

    def const(shape):
        # Same block every chunk -> weights / h0 stay VMEM-resident.
        return pl.BlockSpec(shape, lambda c: tuple(0 for _ in shape))

    kernel = _make_seq_kernel(TC, B, H)
    outs_flat, h_last = pl.pallas_call(
        kernel,
        grid=(C,),   # time-chunk axis is inherently sequential
        in_specs=[
            pl.BlockSpec((TC * B, F), lambda c: (c, 0)),          # x chunk
            const((B, H)),                                        # h0
            pl.BlockSpec((TC * B, O2O_OUT), lambda c: (c, 0)),    # mask chunk
            const((F, H)),                                        # w_xh
            const((1, H)),                                        # b_h
            const((H, H)),                                        # w_hh
            const((F, I2O_OUT)),                                  # w_xo
            const((1, I2O_OUT)),                                  # b_o
            const((H, I2O_OUT)),                                  # w_ho
            const((I2O_OUT, O2O_OUT)),                            # w_top
            const((H, O2O_OUT)),                                  # w_bot
            const((1, O2O_OUT)),                                  # b_o2o
        ],
        out_specs=(pl.BlockSpec((TC * B, O2O_OUT), lambda c: (c, 0)),
                   const((B, H))),
        out_shape=(jax.ShapeDtypeStruct((T * B, O2O_OUT), jnp.float32),
                   jax.ShapeDtypeStruct((B, H), jnp.float32)),
        scratch_shapes=[
            pltpu.VMEM((TC * B, H), jnp.float32),        # x-path pre-activations
            pltpu.VMEM(((TC + 1) * B, H), jnp.float32),  # hidden slab (carry + per-step)
        ],
        compiler_params=pltpu.CompilerParams(
            dimension_semantics=("arbitrary",)),
    )(x_flat, h0, m_flat,
      fused["w_xh"], fused["b_h"], fused["w_hh"],
      fused["w_xo"], fused["b_o"], fused["w_ho"],
      fused["w_top"], fused["w_bot"], fused["b_o2o"])

    return outs_flat.reshape(T, B, O2O_OUT), h_last


# --------------------------------------------------------------------------
if __name__ == "__main__":
    B, H, T = 8, 32, 12
    key = jax.random.PRNGKey(0)
    kp, kx, kxs, km, kms = jax.random.split(key, 5)

    raw = init_params(kp, H)
    fused = fuse_params(raw)

    RTOL, ATOL = 2e-3, 2e-5

    # --- single-step forward (== myRNN.forward) ----------------------------
    x = jax.random.normal(kx, (B, INPUT_FEATS), jnp.float32)
    h0 = jnp.zeros((B, H), jnp.float32)          # initHidden(), batched
    mask = dropout_mask(km, (B, O2O_OUT), training=True)

    out, h1 = my_rnn_step(fused, x, h0, mask)
    jax.block_until_ready((out, h1))
    assert out.shape == (B, O2O_OUT) and out.dtype == jnp.float32
    assert h1.shape == (B, H) and h1.dtype == jnp.float32
    assert bool(jnp.all(jnp.isfinite(out))) and bool(jnp.all(jnp.isfinite(h1)))

    out_r, h1_r = ref_forward(raw, x, h0, mask)
    assert bool(jnp.allclose(out, out_r, rtol=RTOL, atol=ATOL))
    assert bool(jnp.allclose(h1, h1_r, rtol=RTOL, atol=ATOL))

    # --- whole sequence in one kernel --------------------------------------
    x_seq = jax.random.normal(kxs, (T, B, INPUT_FEATS), jnp.float32)
    masks = dropout_mask(kms, (T, B, O2O_OUT), training=True)

    # Pure-JAX reference: step the literal module forward T times.
    h_r = h0
    outs_r = []
    for t in range(T):
        o_t, h_r = ref_forward(raw, x_seq[t], h_r, masks[t])
        outs_r.append(o_t)
    outs_r = jnp.stack(outs_r)

    # (a) one chunk covers the whole sequence (single grid step)
    outs1, hl1 = my_rnn_sequence(fused, x_seq, h0, masks, t_chunk=T)
    jax.block_until_ready((outs1, hl1))
    assert outs1.shape == (T, B, O2O_OUT) and hl1.shape == (B, H)
    assert bool(jnp.allclose(outs1, outs_r, rtol=RTOL, atol=ATOL))
    assert bool(jnp.allclose(hl1, h_r, rtol=RTOL, atol=ATOL))

    # (b) chunked grid (exercises the cross-chunk hidden carry)
    outs2, hl2 = my_rnn_sequence(fused, x_seq, h0, masks, t_chunk=4)
    jax.block_until_ready((outs2, hl2))
    assert bool(jnp.allclose(outs2, outs_r, rtol=RTOL, atol=ATOL))
    assert bool(jnp.allclose(hl2, h_r, rtol=RTOL, atol=ATOL))

    print("KERNEL_OK")
</pallas_src>

<mosaic_0001>
module attributes {stable_mosaic.version = 11 : i64} {
  func.func @rnn_step_kernel(%arg0: memref<8x59xf32, #tpu.memory_space<vmem>>, %arg1: memref<8x32xf32, #tpu.memory_space<vmem>>, %arg2: memref<8x10xf32, #tpu.memory_space<vmem>>, %arg3: memref<59x32xf32, #tpu.memory_space<vmem>>, %arg4: memref<1x32xf32, #tpu.memory_space<vmem>>, %arg5: memref<32x32xf32, #tpu.memory_space<vmem>>, %arg6: memref<59x90xf32, #tpu.memory_space<vmem>>, %arg7: memref<1x90xf32, #tpu.memory_space<vmem>>, %arg8: memref<32x90xf32, #tpu.memory_space<vmem>>, %arg9: memref<90x10xf32, #tpu.memory_space<vmem>>, %arg10: memref<32x10xf32, #tpu.memory_space<vmem>>, %arg11: memref<1x10xf32, #tpu.memory_space<vmem>>, %arg12: memref<8x10xf32, #tpu.memory_space<vmem>>, %arg13: memref<8x32xf32, #tpu.memory_space<vmem>>) attributes {dimension_semantics = [], scalar_prefetch = 0 : i64, scratch_operands = 0 : i64, tpu.core_type = #tpu.core_type<tc>} {
    %c0 = arith.constant 0 : index
    %c0_0 = arith.constant 0 : index
    %0 = vector.load %arg0[%c0, %c0_0] : memref<8x59xf32, #tpu.memory_space<vmem>>, vector<8x59xf32>
    %c0_1 = arith.constant 0 : index
    %c0_2 = arith.constant 0 : index
    %1 = vector.load %arg1[%c0_1, %c0_2] : memref<8x32xf32, #tpu.memory_space<vmem>>, vector<8x32xf32>
    %c0_3 = arith.constant 0 : index
    %c0_4 = arith.constant 0 : index
    %2 = vector.load %arg3[%c0_3, %c0_4] : memref<59x32xf32, #tpu.memory_space<vmem>>, vector<59x32xf32>
    %cst = arith.constant dense<0.000000e+00> : vector<8x32xf32>
    %3 = tpu.matmul %0, %2, %cst {dimension_numbers = #tpu.dot_dimension_numbers<[1], [0], [0], [1], [0, 0, 1, 1], [], []>} : vector<8x59xf32>, vector<59x32xf32>, vector<8x32xf32> -> vector<8x32xf32>
    %c0_5 = arith.constant 0 : index
    %c0_6 = arith.constant 0 : index
    %4 = vector.load %arg5[%c0_5, %c0_6] : memref<32x32xf32, #tpu.memory_space<vmem>>, vector<32x32xf32>
    %cst_7 = arith.constant dense<0.000000e+00> : vector<8x32xf32>
    %5 = tpu.matmul %1, %4, %cst_7 {dimension_numbers = #tpu.dot_dimension_numbers<[1], [0], [0], [1], [0, 0, 1, 1], [], []>} : vector<8x32xf32>, vector<32x32xf32>, vector<8x32xf32> -> vector<8x32xf32>
    %6 = arith.addf %3, %5 : vector<8x32xf32>
    %c0_8 = arith.constant 0 : index
    %c0_9 = arith.constant 0 : index
    %7 = vector.load %arg4[%c0_8, %c0_9] : memref<1x32xf32, #tpu.memory_space<vmem>>, vector<1x32xf32>
    %8 = vector.broadcast %7 : vector<1x32xf32> to vector<8x32xf32>
    %9 = arith.addf %6, %8 : vector<8x32xf32>
    %10 = math.tanh %9 : vector<8x32xf32>
    %c0_10 = arith.constant 0 : index
    %c0_11 = arith.constant 0 : index
    %11 = vector.load %arg6[%c0_10, %c0_11] : memref<59x90xf32, #tpu.memory_space<vmem>>, vector<59x90xf32>
    %cst_12 = arith.constant dense<0.000000e+00> : vector<8x90xf32>
    %12 = tpu.matmul %0, %11, %cst_12 {dimension_numbers = #tpu.dot_dimension_numbers<[1], [0], [0], [1], [0, 0, 1, 1], [], []>} : vector<8x59xf32>, vector<59x90xf32>, vector<8x90xf32> -> vector<8x90xf32>
    %c0_13 = arith.constant 0 : index
    %c0_14 = arith.constant 0 : index
    %13 = vector.load %arg8[%c0_13, %c0_14] : memref<32x90xf32, #tpu.memory_space<vmem>>, vector<32x90xf32>
    %cst_15 = arith.constant dense<0.000000e+00> : vector<8x90xf32>
    %14 = tpu.matmul %1, %13, %cst_15 {dimension_numbers = #tpu.dot_dimension_numbers<[1], [0], [0], [1], [0, 0, 1, 1], [], []>} : vector<8x32xf32>, vector<32x90xf32>, vector<8x90xf32> -> vector<8x90xf32>
    %15 = arith.addf %12, %14 : vector<8x90xf32>
    %c0_16 = arith.constant 0 : index
    %c0_17 = arith.constant 0 : index
    %16 = vector.load %arg7[%c0_16, %c0_17] : memref<1x90xf32, #tpu.memory_space<vmem>>, vector<1x90xf32>
    %17 = vector.broadcast %16 : vector<1x90xf32> to vector<8x90xf32>
    %18 = arith.addf %15, %17 : vector<8x90xf32>
    %c0_18 = arith.constant 0 : index
    %c0_19 = arith.constant 0 : index
    %19 = vector.load %arg9[%c0_18, %c0_19] : memref<90x10xf32, #tpu.memory_space<vmem>>, vector<90x10xf32>
    %cst_20 = arith.constant dense<0.000000e+00> : vector<8x10xf32>
    %20 = tpu.matmul %18, %19, %cst_20 {dimension_numbers = #tpu.dot_dimension_numbers<[1], [0], [0], [1], [0, 0, 1, 1], [], []>} : vector<8x90xf32>, vector<90x10xf32>, vector<8x10xf32> -> vector<8x10xf32>
    %c0_21 = arith.constant 0 : index
    %c0_22 = arith.constant 0 : index
    %21 = vector.load %arg10[%c0_21, %c0_22] : memref<32x10xf32, #tpu.memory_space<vmem>>, vector<32x10xf32>
    %cst_23 = arith.constant dense<0.000000e+00> : vector<8x10xf32>
    %22 = tpu.matmul %10, %21, %cst_23 {dimension_numbers = #tpu.dot_dimension_numbers<[1], [0], [0], [1], [0, 0, 1, 1], [], []>} : vector<8x32xf32>, vector<32x10xf32>, vector<8x10xf32> -> vector<8x10xf32>
    %23 = arith.addf %20, %22 : vector<8x10xf32>
    %c0_24 = arith.constant 0 : index
    %c0_25 = arith.constant 0 : index
    %24 = vector.load %arg11[%c0_24, %c0_25] : memref<1x10xf32, #tpu.memory_space<vmem>>, vector<1x10xf32>
    %25 = vector.broadcast %24 : vector<1x10xf32> to vector<8x10xf32>
    %26 = arith.addf %23, %25 : vector<8x10xf32>
    %cst_26 = arith.constant dense<0xFF800000> : vector<8xf32>
    %27 = vector.multi_reduction <maximumf>, %26, %cst_26 [1] : vector<8x10xf32> to vector<8xf32>
    %28 = vector.shape_cast %27 : vector<8xf32> to vector<8x1xf32>
    %29 = vector.broadcast %28 : vector<8x1xf32> to vector<8x10xf32>
    %30 = arith.subf %26, %29 : vector<8x10xf32>
    %31 = math.exp %30 : vector<8x10xf32>
    %cst_27 = arith.constant dense<0.000000e+00> : vector<8xf32>
    %32 = vector.multi_reduction <add>, %31, %cst_27 [1] : vector<8x10xf32> to vector<8xf32>
    %33 = vector.shape_cast %32 : vector<8xf32> to vector<8x1xf32>
    %34 = vector.broadcast %33 : vector<8x1xf32> to vector<8x10xf32>
    %35 = arith.divf %31, %34 : vector<8x10xf32>
    %c0_28 = arith.constant 0 : index
    %c0_29 = arith.constant 0 : index
    %36 = vector.load %arg2[%c0_28, %c0_29] : memref<8x10xf32, #tpu.memory_space<vmem>>, vector<8x10xf32>
    %37 = arith.mulf %35, %36 : vector<8x10xf32>
    %c0_30 = arith.constant 0 : index
    %c0_31 = arith.constant 0 : index
    %38 = vector.load %arg12[%c0_30, %c0_31] : memref<8x10xf32, #tpu.memory_space<vmem>>, vector<8x10xf32>
    tpu.vector_store %arg12[%c0_30, %c0_31], %37 {strides = array<i32>} : memref<8x10xf32, #tpu.memory_space<vmem>>, vector<8x10xf32>,
    %c0_32 = arith.constant 0 : index
    %c0_33 = arith.constant 0 : index
    %39 = vector.load %arg13[%c0_32, %c0_33] : memref<8x32xf32, #tpu.memory_space<vmem>>, vector<8x32xf32>
    tpu.vector_store %arg13[%c0_32, %c0_33], %10 {strides = array<i32>} : memref<8x32xf32, #tpu.memory_space<vmem>>, vector<8x32xf32>,
    return
  }
}

</mosaic_0001>

<bundles_post_ra>
// kernel: my_rnn_step.1
= control target key start
LH: loop header
LB: loop body
LE: loop exit
PB: predicated region body
PF: predicated region fallthrough
CT: control target
= control target key end

     0   :  { %19 = vsyncpa [#allocation3], 0  ;;  %vm87_vm0 = vcmask 1042432   ;;  %vm220_vm1 = vcmask 1041408   ;;  %vm59_vm2 = vcmask 261120   ;;  %s605_s0 = inlined_call_operand.vmem [shape: f32[8,59], index: 0, kind: input, shape index: {}]   ;;  %s606_s1 = inlined_call_operand.vmem [shape: f32[8,32], index: 1, kind: input, shape index: {}]   ;;  %s607_s2 = inlined_call_operand.vmem [shape: f32[8,10], index: 2, kind: input, shape index: {}]   ;;  %s608_s3 = inlined_call_operand.vmem [shape: f32[59,32], index: 3, kind: input, shape index: {}]   ;;  %s609_s4 = inlined_call_operand.vmem [shape: f32[1,32], index: 4, kind: input, shape index: {}]   ;;  %s610_s5 = inlined_call_operand.vmem [shape: f32[32,32], index: 5, kind: input, shape index: {}]   ;;  %s611_s6 = inlined_call_operand.vmem [shape: f32[59,90], index: 6, kind: input, shape index: {}]   ;;  %s612_s7 = inlined_call_operand.vmem [shape: f32[1,90], index: 7, kind: input, shape index: {}]   ;;  %s613_s8 = inlined_call_operand.vmem [shape: f32[32,90], index: 8, kind: input, shape index: {}]   ;;  %s614_s9 = inlined_call_operand.vmem [shape: f32[90,10], index: 9, kind: input, shape index: {}]   ;;  %s615_s10 = inlined_call_operand.vmem [shape: f32[32,10], index: 10, kind: input, shape index: {}]   ;;  %s616_s11 = inlined_call_operand.vmem [shape: f32[1,10], index: 11, kind: input, shape index: {}]   ;;  %s617_s12 = inlined_call_operand.hbm [shape: f32[8,10], index: 12, kind: output, shape index: {0}]   ;;  %s618_s13 = inlined_call_operand.hbm [shape: f32[8,32], index: 13, kind: output, shape index: {1}]  }
   0x1   :  { %v54_v0 = vld [vmem:[%s608_s3 + $0x38] sm:$0x7]  ;;  %v53_v2 = vld [vmem:[%s608_s3 + $0x30] sm:$0xff]  ;;  %v52_v4 = vld [vmem:[%s608_s3 + $0x28] sm:$0xff] }
   0x2   :  { %v124_v1 = vld [vmem:[%s611_s6 + $0x38] sm:$0x7]  ;;  %311 = vmatpush.msk.msra.mxu1 %vm87_vm0, %v54_v0  ;;  %v123_v3 = vld [vmem:[%s611_s6 + $0x30] sm:$0xff]  ;;  %v122_v5 = vld [vmem:[%s611_s6 + $0x28] sm:$0xff] }
   0x3   :  { %314 = vmatpush.msk.msra.mxu3 %vm87_vm0, %v124_v1  ;;  %v58_v6 = vld [vmem:[%s610_s5 + $0x18] sm:$0xff]  ;;  %v57_v7 = vld [vmem:[%s610_s5 + $0x10] sm:$0xff]  ;;  %v51_v8 = vld [vmem:[%s608_s3 + $0x20] sm:$0xff] }
   0x4   :  { %100 = vmatpush.msra.mxu1 %v53_v2  ;;  %75 = vmatpush.msra.mxu0 %v58_v6  ;;  %v121_v9 = vld [vmem:[%s611_s6 + $0x20] sm:$0xff]  ;;  %v56_v10 = vld [vmem:[%s610_s5 + $0x8] sm:$0xff]  ;;  %v50_v11 = vld [vmem:[%s608_s3 + $0x18] sm:$0xff] }
   0x5   :  { %161 = vmatpush.msra.mxu3 %v123_v3  ;;  %v120_v12 = vld [vmem:[%s611_s6 + $0x18] sm:$0xff]  ;;  %v49_v13 = vld [vmem:[%s608_s3 + $0x10] sm:$0xff]  ;;  %v55_v14 = vld [vmem:[%s610_s5] sm:$0xff] }
   0x6   :  { %101 = vmatpush.msra.mxu1 %v52_v4  ;;  %76 = vmatpush.msra.mxu0 %v57_v7  ;;  %v119_v15 = vld [vmem:[%s611_s6 + $0x10] sm:$0xff]  ;;  %v48_v16 = vld [vmem:[%s608_s3 + $0x8] sm:$0xff]  ;;  %v188_v17 = vld [vmem:[%s614_s9 + $0x58] sm:$0x3] }
   0x7   :  { %162 = vmatpush.msra.mxu3 %v122_v5  ;;  %v118_v18 = vld [vmem:[%s611_s6 + $0x8] sm:$0xff]  ;;  %v46_v19 = vld [vmem:[%s606_s1] sm:$0xff]  ;;  %v187_v20 = vld [vmem:[%s614_s9 + $0x50] sm:$0xff]  ;;  %317 = vmatpush.msk.msra.mxu2 %vm220_vm1, %v188_v17 }
   0x8   :  { %102 = vmatpush.msra.mxu1 %v51_v8  ;;  %77 = vmatpush.msra.mxu0 %v56_v10  ;;  %v128_v21 = vld [vmem:[%s613_s8 + $0x18] sm:$0xff]  ;;  %v186_v22 = vld [vmem:[%s614_s9 + $0x48] sm:$0xff] }
   0x9   :  { %163 = vmatpush.msra.mxu3 %v121_v9 }
   0xa   :  { %103 = vmatpush.msra.mxu1 %v50_v11  ;;  %78 = vmatpush.msra.mxu0 %v55_v14 }
   0xb   :  { %164 = vmatpush.msra.mxu3 %v120_v12 }
   0xc   :  { %104 = vmatpush.msra.mxu1 %v49_v13 }
   0xd   :  { %165 = vmatpush.msra.mxu3 %v119_v15 }
   0xe   :  { %20 = vsyncpa [#allocation5], 0  ;;  %310 = vmatmul.msk.f32.vlgmr.msra.gmra.mxu0 %vm59_vm2, %v46_v19  ;;  %v47_v23 = vld [vmem:[%s608_s3] sm:$0xff]  ;;  %229 = vmatpush.msra.mxu2 %v187_v20  ;;  %vm83_vm3 = vcmask 482304   ;;  %v127_v26 = vld [vmem:[%s613_s8 + $0x10] sm:$0xff]  ;;  %vm216_vm4 = vcmask 736256  }
   0xf   :  { %v117_v24 = vld [vmem:[%s611_s6] sm:$0xff]  ;;  %105 = vmatpush.msra.mxu1 %v48_v16  ;;  %166 = vmatpush.msra.mxu3 %v118_v18  ;;  %v126_v28 = vld [vmem:[%s613_s8 + $0x8] sm:$0xff]  ;;  %v184_v29 = vld [vmem:[%s614_s9 + $0x38] sm:$0xff]  ;;  %vm249_vm5 = vcmask 80896   ;;  %s296_s17 = sshll.u32 %s618_s13, 4  ;;  %s285_s21 = sshll.u32 %s617_s12, 4  ;;  %s297_s17 = int_to_ptr.hbm [resolvable:$true] %s296_s17  ;;  %s286_s21 = int_to_ptr.hbm [resolvable:$true] %s285_s21 }
  0x10   :  { %v45_v25 = vld [vmem:[%s605_s0] sm:$0xff]  ;;  %141 = vmatpush.msrb.mxu0 %v128_v21  ;;  %230 = vmatpush.msra.mxu2 %v186_v22  ;;  %v183_v31 = vld [vmem:[%s614_s9 + $0x30] sm:$0xff]  ;;  %v182_v32 = vld [vmem:[%s614_s9 + $0x28] sm:$0xff] }
  0x11   :  { %v185_v27 = vld [vmem:[%s614_s9 + $0x40] sm:$0xff]  ;;  %106 = vmatpush.msra.mxu1 %v47_v23  ;;  %167 = vmatpush.msra.mxu3 %v117_v24  ;;  %v180_v34 = vld [vmem:[%s614_s9 + $0x18] sm:$0xff]  ;;  %v179_v36 = vld [vmem:[%s614_s9 + $0x10] sm:$0xff] }
  0x12   :  { %312 = vmatmul.msk.f32.vlgmr.msra.gmra.mxu1 %vm83_vm3, %v45_v25  ;;  %142 = vmatpush.msrb.mxu0 %v127_v26  ;;  %v125_v30 = vld [vmem:[%s613_s8] sm:$0xff]  ;;  %v192_v35 = vld [vmem:[%s615_s10 + $0x18] sm:$0xff]  ;;  %v191_v37 = vld [vmem:[%s615_s10 + $0x10] sm:$0xff]  ;;  %s383_s8 = smov [#allocation2]  }
  0x13   :  { %315 = vmatmul.msk.f32.vlgmr.msra.gmra.mxu3 %vm83_vm3, %v45_v25  ;;  %231 = vmatpush.msra.mxu2 %v185_v27  ;;  %v181_v33 = vld [vmem:[%s614_s9 + $0x20] sm:$0xff]  ;;  %v178_v38 = vld [vmem:[%s614_s9 + $0x8] sm:$0xff]  ;;  %s283_s1 = sshll.u32 %s383_s8, 4  ;;  %s284_s1 = int_to_ptr.vmem [resolvable:$true] %s283_s1 }
  0x14   :  { %143 = vmatpush.msrb.mxu0 %v126_v28  ;;  %v190_v39 = vld [vmem:[%s615_s10 + $0x8] sm:$0xff]  ;;  %v177_v40 = vld [vmem:[%s614_s9] sm:$0xff] }
  0x15   :  { %232 = vmatpush.msra.mxu2 %v184_v29  ;;  %v189_v41 = vld [vmem:[%s615_s10] sm:$0xff] }
  0x16   :  { %144 = vmatpush.msrb.mxu0 %v125_v30  ;;  %v321_v43 = vld [vmem:[%s609_s4] ss:$0 sm:$0xff] }
  0x17   :  { %313 = vmatmul.msk.f32.vlgmr.msrb.gmra.mxu0 %vm59_vm2, %v46_v19  ;;  %233 = vmatpush.msra.mxu2 %v183_v31  ;;  %v322_v48 = vld [vmem:[%s612_s7] ss:$0 sm:$0xff]  ;;  %s382_s7 = smov [#allocation4]  }
  0x18   :  { %208 = vmatpush.msra.mxu0 %v192_v35  ;;  %v323_v53 = vld [vmem:[%s616_s11] ss:$0 sm:$0xff]  ;;  %s294_s10 = sshll.u32 %s382_s7, 4  ;;  %s295_s10 = int_to_ptr.vmem [resolvable:$true] %s294_s10 }
  0x19   :  { %234 = vmatpush.msra.mxu2 %v182_v32  ;;  %v274_v11 = vld [vmem:[%s607_s2] sm:$0xff] }
  0x1a   :  { %209 = vmatpush.msra.mxu0 %v191_v37 }
  0x1b   :  { %235 = vmatpush.msra.mxu2 %v181_v33 }
  0x1c   :  { %210 = vmatpush.msra.mxu0 %v190_v39 }
  0x1d   :  { %236 = vmatpush.msra.mxu2 %v180_v34 }
  0x1e   :  { %211 = vmatpush.msra.mxu0 %v189_v41 }
  0x1f   :  { %237 = vmatpush.msra.mxu2 %v179_v36 }
  0x21   :  { %238 = vmatpush.msra.mxu2 %v178_v38 }
  0x23   :  { %239 = vmatpush.msra.mxu2 %v177_v40 }
  0x8b   :  { %v80_v42 = vpop.f32.mrf.mxu0 }
  0x8f   :  { %v108_v44 = vpop.f32.mrf.mxu1 }
  0x90   :  { %v109_v45 = vadd.f32 %v108_v44, %v80_v42 }
  0x92   :  { %v115_v46 = vadd.f32 %v321_v43, %v109_v45 }
  0x94   :  { %324 = vtanh.f32 %v115_v46  ;;  %v146_v47 = vpop.f32.mrf.mxu0 }
  0x96   :  { %v169_v49 = vpop.f32.mrf.mxu3 }
  0x97   :  { %v170_v50 = vadd.f32 %v169_v49, %v146_v47 }
  0x99   :  { %v176_v51 = vadd.f32 %v322_v48, %v170_v50 }
  0x9a   :  { %v325_v52 = vpop.eup %324 }
  0x9b   :  { %277 = vst.msk [vmem:[#allocation4] sm:$0xff] %vm59_vm2, %v325_v52  ;;  %318 = vmatmul.msk.f32.vlgmr.msra.gmra.mxu2 %vm216_vm4, %v176_v51  ;;  %316 = vmatmul.msk.f32.vlgmr.msra.gmra.mxu0 %vm59_vm2, %v325_v52 }
  0x9c   :  { %299 = dma.vmem_to_hbm [thread:$0]  %s295_s10, 128, %s297_s17, [#allocation5]  }
 0x118   :  { %v213_v54 = vpop.f32.mrf.mxu0 }
 0x11e   :  { %v241_v55 = vpop.f32.mrf.mxu2 }
 0x11f   :  { %v242_v56 = vadd.f32 %v241_v55, %v213_v54 }
 0x121   :  { %v248_v57 = vadd.f32 %v323_v53, %v242_v56 }
 0x123   :  { %v250_v58 = vsel %vm249_vm5, %v248_v57, -inf }
 0x124   :  { %251 = vmax.xlane.f32.xlu0 %v250_v58 }
 0x197   :  { %v252_v59 = vpop.xlane.xlu0 %251 }
 0x198   :  { %v253_v60 = vsub.f32 %v248_v57, %v252_v59 }
 0x19a   :  { %v254_v61 = vmul.f32 1.442695, %v253_v60 }
 0x19c   :  { %326 = vpow2.f32 %v254_v61 }
 0x1a2   :  { %v327_v62 = vpop.eup %326 }
 0x1a3   :  { %v256_v63 = vsel %vm249_vm5, %v327_v62, 0.0 }
 0x1a4   :  { %257 = vadd.xlane.f32.xlu0 %v256_v63 }
 0x217   :  { %v258_v0 = vpop.xlane.xlu0 %257 }
 0x218   :  { %328 = vrcp.f32 %v258_v0  ;;  %v270_v4 = vand.u32 2147483648, %v258_v0  ;;  %v268_v6 = vand.u32 2147483647, %v258_v0  ;;  %vm264_vm7 = vweird.f32 %v258_v0 }
 0x21a   :  { %v271_v8 = vor.u32 1.1754944e-38, %v270_v4  ;;  %vm269_vm9 = vcmp.eq.f32.partialorder %v268_v6, 8.507059e+37 }
 0x21e   :  { %v329_v1 = vpop.eup %328 }
 0x21f   :  { %v260_v2 = vmul.f32 %v329_v1, %v258_v0  ;;  %vm265_vm6 = vweird.f32 %v329_v1 }
 0x220   :  { %vm266_vm8 = vmor %vm264_vm7, %vm265_vm6 }
 0x221   :  { %v261_v3 = vsub.f32 1.0, %v260_v2 }
 0x223   :  { %v262_v5 = vmul.f32 %v329_v1, %v261_v3 }
 0x225   :  { %v263_v7 = vadd.f32 %v329_v1, %v262_v5 }
 0x227   :  { %v267_v9 = vsel %vm266_vm8, %v329_v1, %v263_v7 }
 0x228   :  { %v272_v10 = vsel %vm269_vm9, %v271_v8, %v267_v9 }
 0x229   :  { %v273_v12 = vmul.f32 %v327_v62, %v272_v10 }
 0x22b   :  { %v275_v13 = vmul.f32 %v274_v11, %v273_v12 }
 0x22d   :  { %276 = vst.msk [vmem:[#allocation2] sm:$0xff] %vm249_vm5, %v275_v13 }
 0x22e   :  { %288 = dma.vmem_to_hbm [thread:$0]  %s284_s1, 128, %s286_s21, [#allocation3]  }
 0x22f   :  { %378 = dma.done.wait [#allocation3], 128  }
 0x230   :  { %379 = vsyncadd [#allocation3], 4294967168 }
 0x231   :  { %380 = dma.done.wait [#allocation5], 128  }
 0x232   :  { %381 = vsyncadd [#allocation5], 4294967168 }
 0x233   :  { %308 = vsyncpa [#allocation3], 1 }
 0x234   :  { %309 = vsyncpa [#allocation5], 1 }

</bundles_post_ra>
